<compile_context>
chip_gen: v7x
topology: tpu7x:2x2x1
jax: 0.10.0
libtpu: 0.0.40
codegen_flags: <defaults>
</compile_context>

<pallas_src>
import functools

import jax
import jax.numpy as jnp
from jax import lax
from jax.experimental import pallas as pl
from jax.experimental.pallas import tpu as pltpu

LANES = 128


def _kl_kernel(m_ref, lv_ref, out_ref, *, tr, steps, rows_valid, needs_mask):
    c = pl.program_id(0)   # split axis ("parallel")
    i = pl.program_id(1)   # reduction axis ("arbitrary")

    @pl.when(i == 0)
    def _():
        out_ref[...] = jnp.zeros_like(out_ref)

    m = m_ref[...].astype(jnp.float32)
    lv = lv_ref[...].astype(jnp.float32)
    x = 1.0 + lv - m * m - jnp.exp(lv)

    if needs_mask:
        # Logical (unclamped) global row of the first row in this block.
        row0 = (c * steps + i) * tr
        is_interior = row0 + tr <= rows_valid

        @pl.when(is_interior)
        def _():
            # Mask-free hot path for interior blocks: pure VPU adds onto the
            # resident (8,128) f32 output block.
            out_ref[...] += x.reshape(tr // 8, 8, LANES).sum(axis=0)

        @pl.when(jnp.logical_not(is_interior))
        def _():
            # Tail block (Pallas edge padding) or clamped duplicate block:
            # zero invalid rows with a select BEFORE accumulating.
            local = lax.broadcasted_iota(jnp.int32, (tr, LANES), 0)
            xm = jnp.where(row0 + local < rows_valid, x, 0.0)
            out_ref[...] += xm.reshape(tr // 8, 8, LANES).sum(axis=0)
    else:
        out_ref[...] += x.reshape(tr // 8, 8, LANES).sum(axis=0)


def kl_div(mean, log_variance, beta=0.00025, *,
           tile_bytes=4 * 1024 * 1024, num_splits=1):
    """beta * (-0.5) * sum(1 + log_var - mean^2 - exp(log_var)) as a scalar f32."""
    assert mean.shape == log_variance.shape, "mean / log_variance must match"

    n = int(mean.size)
    if n == 0:
        return jnp.zeros((), jnp.float32)

    # Keep the original dtype through the DMA; the kernel upcasts in VMEM.
    m_flat = jnp.ravel(mean)
    lv_flat = jnp.ravel(log_variance)
    itemsize = jnp.dtype(m_flat.dtype).itemsize
    sub = 8 * max(1, 4 // itemsize)   # sublane multiple: 8 f32, 16 bf16/f16, 32 int8

    rows_full = n // LANES            # full lane-dense rows
    n_main = rows_full * LANES

    if rows_full < sub:
        # Tiny input (< one sublane tile): plain JAX, not worth a kernel launch.
        m32 = m_flat.astype(jnp.float32)
        lv32 = lv_flat.astype(jnp.float32)
        total = jnp.sum(1.0 + lv32 - m32 * m32 - jnp.exp(lv32))
        return (-0.5 * beta) * total

    # Fold the <128-element ragged remainder in with plain JAX (no padded copy
    # of the full inputs in HBM).
    if n_main < n:
        mt = m_flat[n_main:].astype(jnp.float32)
        lvt = lv_flat[n_main:].astype(jnp.float32)
        tail = jnp.sum(1.0 + lvt - mt * mt - jnp.exp(lvt))
    else:
        tail = jnp.zeros((), jnp.float32)

    # Lane-dense slab of the 128-aligned prefix (metadata-only reshape when
    # n % 128 == 0).
    m2 = m_flat[:n_main].reshape(rows_full, LANES)
    lv2 = lv_flat[:n_main].reshape(rows_full, LANES)

    # Tile rows for ~tile_bytes per input block (dtype-scaled), sublane aligned,
    # never larger than the slab.
    tr_req = max(sub, (tile_bytes // (LANES * itemsize) // sub) * sub)
    tr = min(tr_req, (rows_full // sub) * sub)
    num_blocks = pl.cdiv(rows_full, tr)
    num_splits = max(1, min(int(num_splits), num_blocks))
    steps = pl.cdiv(num_blocks, num_splits)
    needs_mask = (num_splits * steps * tr) != rows_full

    kernel = functools.partial(
        _kl_kernel, tr=tr, steps=steps, rows_valid=rows_full, needs_mask=needs_mask
    )

    def in_index(c, i):
        # Clamp so over-range logical blocks re-read a valid block; their
        # contribution is zeroed by the in-kernel mask (needs_mask=True then).
        return (jnp.minimum(c * steps + i, num_blocks - 1), 0)

    partials = pl.pallas_call(
        kernel,
        out_shape=jax.ShapeDtypeStruct((num_splits * 8, LANES), jnp.float32),
        grid_spec=pltpu.PrefetchScalarGridSpec(
            num_scalar_prefetch=0,
            grid=(num_splits, steps),
            in_specs=[
                pl.BlockSpec((tr, LANES), in_index),
                pl.BlockSpec((tr, LANES), in_index),
            ],
            # The output block itself is the resident accumulator (same block
            # index across the reduction axis); lane-dense (8,128) per split.
            out_specs=pl.BlockSpec((8, LANES), lambda c, i: (c, 0)),
        ),
        compiler_params=pltpu.CompilerParams(
            dimension_semantics=("parallel", "arbitrary"),
            # 2 inputs x 2 pipeline buffers x ~4 MiB = ~16 MiB; 48 MiB leaves
            # headroom on v5e (16 MiB default scoped) and fits v7x's 64 MiB.
            vmem_limit_bytes=48 * 1024 * 1024,
        ),
    )(m2, lv2)

    return (-0.5 * beta) * (jnp.sum(partials) + tail)


def _reference(mean, log_variance, beta):
    m = mean.astype(jnp.float32)
    lv = log_variance.astype(jnp.float32)
    return beta * (-0.5) * jnp.sum(1.0 + lv - m * m - jnp.exp(lv))


def _check(out, ref, name):
    assert jnp.allclose(out, ref, rtol=5e-5, atol=1e-5), (name, out, ref)


if __name__ == "__main__":
    beta = 0.00025
    key = jax.random.PRNGKey(0)
    k1, k2, k3, k4, k5, k6, k7, k8 = jax.random.split(key, 8)

    # Case 1: conv-VAE latent stats (2, 4, 16, 16) -> lane-aligned, single block.
    mean1 = jax.random.normal(k1, (2, 4, 16, 16), dtype=jnp.float32)
    lvar1 = jax.random.normal(k2, (2, 4, 16, 16), dtype=jnp.float32) * 0.5
    out1 = jax.block_until_ready(kl_div(mean1, lvar1, beta=beta))
    _check(out1, _reference(mean1, lvar1, beta), "case1")

    # Case 2: ragged numel (2, 4, 15, 15) -> kernel on aligned prefix (masked
    # tail block) + <128-element remainder folded in with plain JAX.
    mean2 = jax.random.normal(k3, (2, 4, 15, 15), dtype=jnp.float32)
    lvar2 = jax.random.normal(k4, (2, 4, 15, 15), dtype=jnp.float32) * 0.5
    out2 = jax.block_until_ready(kl_div(mean2, lvar2, beta=beta))
    _check(out2, _reference(mean2, lvar2, beta), "case2")

    # Case 3: bf16 inputs, small tile + num_splits=2 to exercise the multi-step
    # accumulator and the split ("parallel") axis.
    mean3 = jax.random.normal(k5, (4, 8192), dtype=jnp.float32).astype(jnp.bfloat16)
    lvar3 = (jax.random.normal(k6, (4, 8192), dtype=jnp.float32) * 0.5).astype(jnp.bfloat16)
    out3 = jax.block_until_ready(
        kl_div(mean3, lvar3, beta=beta, tile_bytes=16 * 1024, num_splits=2))
    _check(out3, _reference(mean3, lvar3, beta), "case3")

    # Case 4: tiny latent (2, 32) -> pure-JAX fallback path.
    mean4 = jax.random.normal(k7, (2, 32), dtype=jnp.float32)
    lvar4 = jax.random.normal(k8, (2, 32), dtype=jnp.float32) * 0.5
    out4 = jax.block_until_ready(kl_div(mean4, lvar4, beta=beta))
    _check(out4, _reference(mean4, lvar4, beta), "case4")

    print("KERNEL_OK")
</pallas_src>

<mosaic_0001>
module attributes {stable_mosaic.version = 11 : i64} {
  func.func @_kl_kernel(%arg0: i32, %arg1: i32, %arg2: memref<16x128xf32, #tpu.memory_space<vmem>>, %arg3: memref<16x128xf32, #tpu.memory_space<vmem>>, %arg4: memref<8x128xf32, #tpu.memory_space<vmem>>) attributes {dimension_semantics = [#tpu.dimension_semantics<parallel>, #tpu.dimension_semantics<arbitrary>], iteration_bounds = array<i64: 1, 1>, scalar_prefetch = 0 : i64, scratch_operands = 0 : i64, tpu.core_type = #tpu.core_type<tc>, window_params = [{transform_indices = @transform_0, window_bounds = array<i64: 16, 128>}, {transform_indices = @transform_1, window_bounds = array<i64: 16, 128>}, {transform_indices = @transform_2, window_bounds = array<i64: 8, 128>}]} {
    %c0_i32 = arith.constant 0 : i32
    %0 = arith.cmpi eq, %arg1, %c0_i32 : i32
    %1 = arith.extui %0 : i1 to i32
    %c0_i32_0 = arith.constant 0 : i32
    %2 = arith.cmpi ne, %1, %c0_i32_0 : i32
    scf.if %2 {
      %cst_9 = arith.constant 0.000000e+00 : f32
      %16 = vector.broadcast %cst_9 : f32 to vector<8x128xf32>
      %c0_10 = arith.constant 0 : index
      %c0_11 = arith.constant 0 : index
      %17 = vector.load %arg4[%c0_10, %c0_11] : memref<8x128xf32, #tpu.memory_space<vmem>>, vector<8x128xf32>
      tpu.vector_store %arg4[%c0_10, %c0_11], %16 {strides = array<i32>} : memref<8x128xf32, #tpu.memory_space<vmem>>, vector<8x128xf32>,
    } else {
    }
    %c0 = arith.constant 0 : index
    %c0_1 = arith.constant 0 : index
    %3 = vector.load %arg2[%c0, %c0_1] : memref<16x128xf32, #tpu.memory_space<vmem>>, vector<16x128xf32>
    %c0_2 = arith.constant 0 : index
    %c0_3 = arith.constant 0 : index
    %4 = vector.load %arg3[%c0_2, %c0_3] : memref<16x128xf32, #tpu.memory_space<vmem>>, vector<16x128xf32>
    %cst = arith.constant 1.000000e+00 : f32
    %5 = vector.broadcast %cst : f32 to vector<16x128xf32>
    %6 = arith.addf %5, %4 : vector<16x128xf32>
    %7 = arith.mulf %3, %3 : vector<16x128xf32>
    %8 = arith.subf %6, %7 : vector<16x128xf32>
    %9 = math.exp %4 : vector<16x128xf32>
    %10 = arith.subf %8, %9 : vector<16x128xf32>
    %c0_4 = arith.constant 0 : index
    %c0_5 = arith.constant 0 : index
    %11 = vector.load %arg4[%c0_4, %c0_5] : memref<8x128xf32, #tpu.memory_space<vmem>>, vector<8x128xf32>
    %12 = vector.shape_cast %10 : vector<16x128xf32> to vector<2x8x128xf32>
    %cst_6 = arith.constant dense<0.000000e+00> : vector<8x128xf32>
    %13 = vector.multi_reduction <add>, %12, %cst_6 [0] : vector<2x8x128xf32> to vector<8x128xf32>
    %14 = arith.addf %11, %13 : vector<8x128xf32>
    %c0_7 = arith.constant 0 : index
    %c0_8 = arith.constant 0 : index
    %15 = vector.load %arg4[%c0_7, %c0_8] : memref<8x128xf32, #tpu.memory_space<vmem>>, vector<8x128xf32>
    tpu.vector_store %arg4[%c0_7, %c0_8], %14 {strides = array<i32>} : memref<8x128xf32, #tpu.memory_space<vmem>>, vector<8x128xf32>,
    return
  }
  func.func @transform_0(%arg0: i32, %arg1: i32) -> (i32, i32) {
    %c1_i32 = arith.constant 1 : i32
    %0 = arith.muli %arg0, %c1_i32 : i32
    %1 = arith.addi %0, %arg1 : i32
    %c0_i32 = arith.constant 0 : i32
    %2 = arith.minsi %1, %c0_i32 : i32
    %c0_i32_0 = arith.constant 0 : i32
    %c0_i32_1 = arith.constant 0 : i32
    return %2, %c0_i32_0 : i32, i32
  }
  func.func @transform_1(%arg0: i32, %arg1: i32) -> (i32, i32) {
    %c1_i32 = arith.constant 1 : i32
    %0 = arith.muli %arg0, %c1_i32 : i32
    %1 = arith.addi %0, %arg1 : i32
    %c0_i32 = arith.constant 0 : i32
    %2 = arith.minsi %1, %c0_i32 : i32
    %c0_i32_0 = arith.constant 0 : i32
    %c0_i32_1 = arith.constant 0 : i32
    return %2, %c0_i32_0 : i32, i32
  }
  func.func @transform_2(%arg0: i32, %arg1: i32) -> (i32, i32) {
    %c0_i32 = arith.constant 0 : i32
    %c0_i32_0 = arith.constant 0 : i32
    return %arg0, %c0_i32 : i32, i32
  }
}

</mosaic_0001>

<bundles_post_ra>
// kernel: tpu_custom_call.1
= control target key start
LH: loop header
LB: loop body
LE: loop exit
PB: predicated region body
PF: predicated region fallthrough
CT: control target
= control target key end

     0   :  { %7 = vsyncpa [#allocation3], 0  ;;  %s243_s0 = inlined_call_operand.hbm [shape: f32[16,128], index: 0, kind: input, shape index: {}]   ;;  %s244_s1 = inlined_call_operand.hbm [shape: f32[16,128], index: 1, kind: input, shape index: {}]   ;;  %s245_s2 = inlined_call_operand.hbm [shape: f32[8,128], index: 2, kind: output, shape index: {}]  }
   0x1   :  { %8 = vsyncpa [#allocation6], 0 }
   0x2   :  { %9 = vsyncpa [#allocation4], 0  ;;  %s187_s9 = smov [#allocation2]   ;;  %s115_s13 = scalar_lea.hbm %s243_s0, 256 }
   0x3   :  { %s21_s10 = sshll.u32 %s187_s9, 4  ;;  %p116_p0 = scmp.ne.s32.totalorder %s243_s0, %s115_s13  ;;  %s22_s10 = int_to_ptr.vmem [resolvable:$true] %s21_s10 }
   0x4   :  { %p119_p1 = scmp.lt.u32.totalorder %s115_s13, %s243_s0 }
   0x6   :  { %p121_p2 = pnand %p119_p1, %p116_p0 }
   0x8   :  { %124 = shalt.err (!%p121_p2)
}
   0x9   :  { %s125_s18 = scalar_lea.vmem %s22_s10, 256  ;;  %p130_p4 = scmp.lt.s32.totalorder %s22_s10, %s22_s10 }
   0xa   :  { %p126_p3 = scmp.ne.s32.totalorder %s22_s10, %s125_s18  ;;  %p131_p5 = scmp.lt.s32.totalorder %s125_s18, %s125_s18 }
   0xc   :  { %p132_p6 = por %p131_p5, %p130_p4 }
   0xe   :  { %p133_p7 = pnand %p132_p6, %p126_p3 }
  0x10   :  { %136 = shalt.err (!%p133_p7)
}
  0x11   :  { %s188_s19 = smov 128   ;;  %s189_s20 = smov 8  }
  0x12   :  { %27 = dma.hbm_to_vmem [thread:$0]  %s243_s0, 256, %s22_s10, [#allocation3], %s188_s19, %s188_s19, %s189_s20  }
  0x13   :  { %s190_s23 = smov [#allocation5]   ;;  %s137_s27 = scalar_lea.hbm %s244_s1, 256 }
  0x14   :  { %s39_s24 = sshll.u32 %s190_s23, 4  ;;  %p138_p8 = scmp.ne.s32.totalorder %s244_s1, %s137_s27  ;;  %s40_s24 = int_to_ptr.vmem [resolvable:$true] %s39_s24 }
  0x15   :  { %p141_p9 = scmp.lt.u32.totalorder %s137_s27, %s244_s1 }
  0x17   :  { %p143_p10 = pnand %p141_p9, %p138_p8 }
  0x19   :  { %146 = shalt.err (!%p143_p10)
}
  0x1a   :  { %s147_s4 = scalar_lea.vmem %s40_s24, 256  ;;  %p152_p12 = scmp.lt.s32.totalorder %s40_s24, %s40_s24 }
  0x1b   :  { %p148_p11 = scmp.ne.s32.totalorder %s40_s24, %s147_s4  ;;  %p153_p13 = scmp.lt.s32.totalorder %s147_s4, %s147_s4 }
  0x1d   :  { %p154_p0 = por %p153_p13, %p152_p12 }
  0x1f   :  { %p155_p1 = pnand %p154_p0, %p148_p11 }
  0x21   :  { %158 = shalt.err (!%p155_p1)
}
  0x22   :  { %45 = dma.hbm_to_vmem [thread:$0]  %s244_s1, 256, %s40_s24, [#allocation6], %s188_s19, %s188_s19, %s189_s20  }
  0x23   :  { %181 = dma.done.wait [#allocation3], 256  }
  0x24   :  { %182 = vsyncadd [#allocation3], 4294967040 }
  0x25   :  { %183 = dma.done.wait [#allocation6], 256  }
  0x26   :  { %184 = vsyncadd [#allocation6], 4294967040  ;;  %v67_v0 = vld [vmem:[#allocation5] sm:$0xff]  ;;  %v68_v1 = vld [vmem:[#allocation5 + $0x8] sm:$0xff]  ;;  %s191_s1 = smov [#allocation7]  }
  0x27   :  { %v75_v2 = vmul.f32 1.442695, %v67_v0  ;;  %v77_v3 = vmul.f32 1.442695, %v68_v1  ;;  %v65_v4 = vld [vmem:[#allocation2] sm:$0xff]  ;;  %v66_v5 = vld [vmem:[#allocation2 + $0x8] sm:$0xff] }
  0x28   :  { %v69_v6 = vadd.f32 1.0, %v67_v0  ;;  %v71_v7 = vmul.f32 %v65_v4, %v65_v4  ;;  %v70_v8 = vadd.f32 1.0, %v68_v1  ;;  %v72_v9 = vmul.f32 %v66_v5, %v66_v5  ;;  %s91_s6 = sshll.u32 %s191_s1, 4  ;;  %s92_s6 = int_to_ptr.vmem [resolvable:$true] %s91_s6 }
  0x29   :  { %111 = vpow2.f32 %v75_v2  ;;  %s159_s7 = scalar_lea.vmem %s92_s6, 128  ;;  %p164_p3 = scmp.lt.s32.totalorder %s92_s6, %s92_s6 }
  0x2a   :  { %113 = vpow2.f32 %v77_v3  ;;  %v73_v10 = vsub.f32 %v69_v6, %v71_v7  ;;  %v74_v11 = vsub.f32 %v70_v8, %v72_v9  ;;  %p160_p2 = scmp.ne.s32.totalorder %s92_s6, %s159_s7  ;;  %p165_p4 = scmp.lt.s32.totalorder %s159_s7, %s159_s7 }
  0x2c   :  { %p166_p5 = por %p165_p4, %p164_p3 }
  0x2e   :  { %p167_p6 = pnand %p166_p5, %p160_p2 }
  0x33   :  { %v112_v12 = vpop.eup %111 }
  0x34   :  { %v114_v13 = vpop.eup %113  ;;  %v79_v14 = vsub.f32 %v73_v10, %v112_v12 }
  0x35   :  { %v80_v15 = vsub.f32 %v74_v11, %v114_v13 }
  0x37   :  { %v82_v16 = vadd.f32 %v80_v15, %v79_v14 }
  0x39   :  { %84 = vst [vmem:[#allocation7] sm:$0xff] %v82_v16 }
  0x3a   :  { %170 = shalt.err (!%p167_p6)
}
  0x3b   :  { %s171_s10 = scalar_lea.hbm %s245_s2, 128 }
  0x3c   :  { %p172_p7 = scmp.ne.s32.totalorder %s245_s2, %s171_s10  ;;  %p175_p8 = scmp.lt.u32.totalorder %s171_s10, %s245_s2 }
  0x3e   :  { %p177_p9 = pnand %p175_p8, %p172_p7 }
  0x40   :  { %180 = shalt.err (!%p177_p9)
}
  0x41   :  { %94 = dma.vmem_to_hbm [thread:$0]  %s92_s6, 128, %s245_s2, [#allocation4]  }
  0x42   :  { %185 = dma.done.wait [#allocation4], 128  }
  0x43   :  { %186 = vsyncadd [#allocation4], 4294967168 }
  0x44   :  { %98 = vsyncpa [#allocation3], 1 }
  0x45   :  { %99 = vsyncpa [#allocation6], 1 }
  0x46   :  { %100 = vsyncpa [#allocation4], 1 }

</bundles_post_ra>
